<compile_context>
chip_gen: v6e
topology: v6e:2x2x1
jax: 0.10.0
libtpu: 0.0.40
codegen_flags: <defaults>
</compile_context>

<pallas_src>
import jax
import jax.numpy as jnp
from jax.experimental import pallas as pl
from jax.experimental.pallas import tpu as pltpu

# Fixed (deterministic) PreEmph conv filter coefficients from the module __init__.
_PRE_EMPH_W0 = -0.95   # applied to v[t-1]
_PRE_EMPH_W1 = 1.0     # applied to v[t]  (folded out below since it is exactly 1.0)
_EPSILON = 1e-5


def _round_up(a, m):
    return (a + m - 1) // m * m


def _make_esr_kernel(*, B, L, rows, n_valid, need_mask):
    """Kernel over a [grid*rows, L] lane-dense view of the flattened [T*B] stream."""
    shift = B % L  # shift == 0 only when L == B (i.e. 128 | B); then the lane roll is identity

    def kernel(x_ref, y_ref, out_ref, num_acc, en_acc, carry_u, carry_y):
        t = pl.program_id(0)
        nt = pl.num_programs(0)

        @pl.when(t == 0)
        def _init():
            num_acc[...] = jnp.zeros_like(num_acc)
            en_acc[...] = jnp.zeros_like(en_acc)
            carry_u[...] = jnp.zeros_like(carry_u)   # zero carry == v[-1] = 0 semantics
            carry_y[...] = jnp.zeros_like(carry_y)

        # Upcast immediately after load so all arithmetic is f32 (bf16 inputs DMA at 2B/elem).
        x = x_ref[...].astype(jnp.float32)           # output,  flat index f = row*L + lane
        y = y_ref[...].astype(jnp.float32)           # target
        R = x.shape[0]

        # Narrow iotas only (avoid materializing full (R, L) int32 tiles).
        lane = jax.lax.broadcasted_iota(jnp.int32, (1, L), 1)   # (1, L)
        row = jax.lax.broadcasted_iota(jnp.int32, (R, 1), 0)    # (R, 1)

        # pre(target) - pre(output) == pre(target - output): roll/shift u instead of x.
        u = y - x

        # One time step back == B positions back in the flat stream.
        # v_sl[r, j] == v[r, j - B] for j >= B (same row).
        if shift != 0:
            u_sl = pltpu.roll(u, shift=shift, axis=1)
            y_sl = pltpu.roll(y, shift=shift, axis=1)
        else:
            u_sl, y_sl = u, y

        # Lanes j < B need the previous row's tail: v[r-1, L-B+j] == v_sl[r-1, j].
        if R > 1:
            u_up = pltpu.roll(u_sl, shift=1, axis=0)
            y_up = pltpu.roll(y_sl, shift=1, axis=0)
        else:
            u_up, y_up = u_sl, y_sl

        # Row 0 of this tile gets the carry (previous tile's lane-shifted last row).
        row0 = row == 0
        u_up = jnp.where(row0, carry_u[...], u_up)
        y_up = jnp.where(row0, carry_y[...], y_up)

        if shift != 0:
            in_wrap = lane < B                       # (1, L) mask, broadcast over rows
            u_prev = jnp.where(in_wrap, u_up, u_sl)
            y_prev = jnp.where(in_wrap, y_up, y_sl)
        else:
            u_prev, y_prev = u_up, y_up

        # Stash the carry for the next tile (after the carry reads above).
        carry_u[...] = u_sl[R - 1:R, :]
        carry_y[...] = y_sl[R - 1:R, :]

        # Pre-emphasis: pre[t] = v[t] - 0.95 * v[t-1]  (the 1.0 tap is folded out).
        d = u + _PRE_EMPH_W0 * u_prev                # pre(target) - pre(output)
        e = y + _PRE_EMPH_W0 * y_prev                # pre(target)
        d2 = d * d
        e2 = e * e

        if need_mask:
            # Zero contributions of element padding and of Pallas-padded (garbage)
            # rows in a ragged last block. jnp.where is a select, so inf/NaN garbage
            # in the masked-out branch does not propagate.
            grow = row + t * rows                    # global row index, (R, 1)
            full_rows = n_valid // L
            rem = n_valid % L
            valid = (grow < full_rows) | ((grow == full_rows) & (lane < rem))
            d2 = jnp.where(valid, d2, 0.0)
            e2 = jnp.where(valid, e2, 0.0)

        # Per-tile partial sums (sublane reduce), accumulated across the grid in scratch.
        num_acc[...] += jnp.sum(d2, axis=0, keepdims=True)
        en_acc[...] += jnp.sum(e2, axis=0, keepdims=True)

        @pl.when(t == nt - 1)
        def _finalize():
            num = jnp.sum(num_acc[...], keepdims=True)   # (1, 1)
            en = jnp.sum(en_acc[...], keepdims=True)     # (1, 1)
            # mean(d^2) / (mean(pre(target)^2) + eps) == num / (en + eps * N); exact divide.
            out_ref[...] = num / (en + _EPSILON * float(n_valid))

    return kernel


def esr_loss(output, target, *, tile_bytes=2 << 20):
    """output, target: [T, B, 1] (PyTorch convention) or [T, B]. Returns scalar f32 loss.

    tile_bytes bounds the per-input f32 working set of one grid step (~2 MiB default;
    raise vmem_limit_bytes accordingly if you push it to 4 MiB+).
    """
    assert output.shape == target.shape, "output/target shape mismatch"
    shp = output.shape
    assert len(shp) >= 2, "expected [T, B, 1] (or [T, B]) inputs"
    trailing = 1
    for d in shp[2:]:
        trailing *= int(d)
    assert trailing == 1, "channel dim must be 1 (Conv1d(1, 1, 2))"
    T, B = int(shp[0]), int(shp[1])
    N = T * B

    # Free reshape of the time-major stream (no HBM transpose): flat index f = t*B + b.
    x = jnp.reshape(output, (N,))
    y = jnp.reshape(target, (N,))

    # Keep f32/bf16 native (upcast happens in VMEM); anything else goes through f32.
    if x.dtype == jnp.float32:
        sub = 8
    elif x.dtype == jnp.bfloat16:
        sub = 16                                    # bf16 blocks need sublane multiple of 16
    else:
        x = x.astype(jnp.float32)
        y = y.astype(jnp.float32)
        sub = 8
    elem_bytes = jnp.dtype(x.dtype).itemsize

    # Lane-dense view: rows of L = round_up(B, 128) contiguous samples.  The roll+carry
    # construction only needs 128 | L and L >= B (B need not divide L).
    L = _round_up(B, 128)

    # Element padding only when T*B is not a multiple of L (pad to the next multiple of
    # L only; ragged last grid blocks are handled by Pallas + in-kernel masking).
    if N % L != 0:
        n_elems = _round_up(N, L)
        x = jnp.pad(x, (0, n_elems - N))
        y = jnp.pad(y, (0, n_elems - N))
    else:
        n_elems = N
    total_rows = n_elems // L
    x = x.reshape(total_rows, L)
    y = y.reshape(total_rows, L)

    # Rows per block: ~tile_bytes of f32 working set per input per grid step.
    max_rows = max(sub, (tile_bytes // (L * 4)) // sub * sub)
    if total_rows <= max_rows:
        grid = 1
        rows = total_rows                            # full-dim block (any row count is legal)
    else:
        grid = pl.cdiv(total_rows, max_rows)
        rows = _round_up(pl.cdiv(total_rows, grid), sub)   # balanced; grid*rows >= total_rows
    need_mask = (grid * rows * L) != N

    kernel = _make_esr_kernel(B=B, L=L, rows=rows, n_valid=N, need_mask=need_mask)

    res = pl.pallas_call(
        kernel,
        out_shape=jax.ShapeDtypeStruct((1, 1), jnp.float32),
        grid_spec=pltpu.PrefetchScalarGridSpec(
            num_scalar_prefetch=0,
            grid=(grid,),
            in_specs=[
                pl.BlockSpec((rows, L), lambda t: (t, 0)),
                pl.BlockSpec((rows, L), lambda t: (t, 0)),
            ],
            out_specs=pl.BlockSpec((1, 1), lambda t: (0, 0)),
            scratch_shapes=[
                pltpu.VMEM((1, L), jnp.float32),   # partial sum((pre(t)-pre(o))^2)
                pltpu.VMEM((1, L), jnp.float32),   # partial sum(pre(t)^2)
                pltpu.VMEM((1, L), jnp.float32),   # carry: lane-shifted last row of (target-output)
                pltpu.VMEM((1, L), jnp.float32),   # carry: lane-shifted last row of target
            ],
        ),
        compiler_params=pltpu.CompilerParams(
            dimension_semantics=("arbitrary",),      # grid axis is a sequential reduction
            vmem_limit_bytes=32 * 1024 * 1024,
        ),
        cost_estimate=pl.CostEstimate(
            flops=10 * N,
            transcendentals=0,
            bytes_accessed=2 * N * elem_bytes + 4,
        ),
    )(x, y)
    return res[0, 0]


def _esr_loss_ref(output, target):
    """Plain-JAX reference (mirrors the PyTorch module) for sanity checking."""
    x = jnp.reshape(output, (output.shape[0], output.shape[1])).astype(jnp.float32)  # [T, B]
    y = jnp.reshape(target, (target.shape[0], target.shape[1])).astype(jnp.float32)
    zpad = jnp.zeros((1, x.shape[1]), jnp.float32)
    x_prev = jnp.concatenate([zpad, x[:-1]], axis=0)
    y_prev = jnp.concatenate([zpad, y[:-1]], axis=0)
    px = _PRE_EMPH_W1 * x + _PRE_EMPH_W0 * x_prev
    py = _PRE_EMPH_W1 * y + _PRE_EMPH_W0 * y_prev
    num = jnp.mean((py - px) ** 2)
    energy = jnp.mean(py ** 2) + _EPSILON
    return num / energy


if __name__ == "__main__":
    key = jax.random.PRNGKey(0)
    # (T, B, dtype, tile_bytes override) — covers:
    #   single-row tile with element padding; exact fit; multi-tile with ragged last
    #   block + element pad (boundary carry); 128|B identity-roll path; B>128 lane
    #   roll across vregs; bf16 multi-tile ragged path (in-kernel upcast).
    cases = [
        (16, 4, jnp.float32, None, 1e-5),
        (256, 4, jnp.float32, None, 1e-5),
        (300, 4, jnp.float32, 4096, 1e-5),
        (64, 128, jnp.float32, None, 1e-5),
        (50, 160, jnp.float32, 8192, 1e-5),
        (2048, 3, jnp.bfloat16, 16384, 1e-4),
    ]
    for (T, B, dt, tb, rtol) in cases:
        key, k1, k2 = jax.random.split(key, 3)
        out = jax.random.normal(k1, (T, B, 1), dtype=jnp.float32).astype(dt)
        tgt = jax.random.normal(k2, (T, B, 1), dtype=jnp.float32).astype(dt)
        kwargs = {} if tb is None else {"tile_bytes": tb}
        loss = jax.block_until_ready(esr_loss(out, tgt, **kwargs))
        ref = jax.block_until_ready(_esr_loss_ref(out, tgt))
        assert jnp.allclose(loss, ref, rtol=rtol, atol=1e-5), (T, B, dt, loss, ref)
    print("KERNEL_OK")
</pallas_src>

<mosaic_0001>
module attributes {stable_mosaic.version = 11 : i64} {
  func.func @kernel(%arg0: i32, %arg1: memref<1x128xf32, #tpu.memory_space<vmem>>, %arg2: memref<1x128xf32, #tpu.memory_space<vmem>>, %arg3: memref<1x1xf32, #tpu.memory_space<vmem>>, %arg4: memref<1x128xf32, #tpu.memory_space<vmem>>, %arg5: memref<1x128xf32, #tpu.memory_space<vmem>>, %arg6: memref<1x128xf32, #tpu.memory_space<vmem>>, %arg7: memref<1x128xf32, #tpu.memory_space<vmem>>) attributes {dimension_semantics = [#tpu.dimension_semantics<arbitrary>], iteration_bounds = array<i64: 1>, scalar_prefetch = 0 : i64, scratch_operands = 4 : i64, tpu.core_type = #tpu.core_type<tc>, window_params = [{transform_indices = @transform_0, window_bounds = array<i64: 1, 128>}, {transform_indices = @transform_1, window_bounds = array<i64: 1, 128>}, {pipeline_mode = #tpu.pipeline_mode<synchronous>, transform_indices = @transform_2, window_bounds = array<i64: 1, 1>}]} {
    %c0_i32 = arith.constant 0 : i32
    %0 = arith.cmpi eq, %arg0, %c0_i32 : i32
    %1 = arith.extui %0 : i1 to i32
    %c0_i32_0 = arith.constant 0 : i32
    %2 = arith.cmpi ne, %1, %c0_i32_0 : i32
    scf.if %2 {
      %cst_32 = arith.constant 0.000000e+00 : f32
      %64 = vector.broadcast %cst_32 : f32 to vector<1x128xf32>
      %c0_33 = arith.constant 0 : index
      %c0_34 = arith.constant 0 : index
      %65 = vector.load %arg4[%c0_33, %c0_34] : memref<1x128xf32, #tpu.memory_space<vmem>>, vector<1x128xf32>
      tpu.vector_store %arg4[%c0_33, %c0_34], %64 {strides = array<i32>} : memref<1x128xf32, #tpu.memory_space<vmem>>, vector<1x128xf32>,
      %cst_35 = arith.constant 0.000000e+00 : f32
      %66 = vector.broadcast %cst_35 : f32 to vector<1x128xf32>
      %c0_36 = arith.constant 0 : index
      %c0_37 = arith.constant 0 : index
      %67 = vector.load %arg5[%c0_36, %c0_37] : memref<1x128xf32, #tpu.memory_space<vmem>>, vector<1x128xf32>
      tpu.vector_store %arg5[%c0_36, %c0_37], %66 {strides = array<i32>} : memref<1x128xf32, #tpu.memory_space<vmem>>, vector<1x128xf32>,
      %cst_38 = arith.constant 0.000000e+00 : f32
      %68 = vector.broadcast %cst_38 : f32 to vector<1x128xf32>
      %c0_39 = arith.constant 0 : index
      %c0_40 = arith.constant 0 : index
      %69 = vector.load %arg6[%c0_39, %c0_40] : memref<1x128xf32, #tpu.memory_space<vmem>>, vector<1x128xf32>
      tpu.vector_store %arg6[%c0_39, %c0_40], %68 {strides = array<i32>} : memref<1x128xf32, #tpu.memory_space<vmem>>, vector<1x128xf32>,
      %cst_41 = arith.constant 0.000000e+00 : f32
      %70 = vector.broadcast %cst_41 : f32 to vector<1x128xf32>
      %c0_42 = arith.constant 0 : index
      %c0_43 = arith.constant 0 : index
      %71 = vector.load %arg7[%c0_42, %c0_43] : memref<1x128xf32, #tpu.memory_space<vmem>>, vector<1x128xf32>
      tpu.vector_store %arg7[%c0_42, %c0_43], %70 {strides = array<i32>} : memref<1x128xf32, #tpu.memory_space<vmem>>, vector<1x128xf32>,
    } else {
    }
    %c0 = arith.constant 0 : index
    %c0_1 = arith.constant 0 : index
    %3 = vector.load %arg1[%c0, %c0_1] : memref<1x128xf32, #tpu.memory_space<vmem>>, vector<1x128xf32>
    %c0_2 = arith.constant 0 : index
    %c0_3 = arith.constant 0 : index
    %4 = vector.load %arg2[%c0_2, %c0_3] : memref<1x128xf32, #tpu.memory_space<vmem>>, vector<1x128xf32>
    %5 = tpu.iota {dimensions = array<i32: 1>} : vector<1x128xi32>
    %6 = tpu.iota {dimensions = array<i32: 0>} : vector<1x1xi32>
    %7 = arith.subf %4, %3 : vector<1x128xf32>
    %c4_i32 = arith.constant 4 : i32
    %8 = tpu.dynamic_rotate %7 by %c4_i32 dim 1 : vector<1x128xf32>, i32 -> vector<1x128xf32>
    %c4_i32_4 = arith.constant 4 : i32
    %9 = tpu.dynamic_rotate %4 by %c4_i32_4 dim 1 : vector<1x128xf32>, i32 -> vector<1x128xf32>
    %c0_i32_5 = arith.constant 0 : i32
    %10 = vector.broadcast %c0_i32_5 : i32 to vector<1x1xi32>
    %11 = arith.cmpi eq, %6, %10 : vector<1x1xi32>
    %c0_6 = arith.constant 0 : index
    %c0_7 = arith.constant 0 : index
    %12 = vector.load %arg6[%c0_6, %c0_7] : memref<1x128xf32, #tpu.memory_space<vmem>>, vector<1x128xf32>
    %13 = vector.shape_cast %11 : vector<1x1xi1> to vector<1x1xi1>
    %14 = vector.broadcast %13 : vector<1x1xi1> to vector<1x128xi1>
    %15 = arith.select %14, %12, %8 : vector<1x128xi1>, vector<1x128xf32>
    %c0_8 = arith.constant 0 : index
    %c0_9 = arith.constant 0 : index
    %16 = vector.load %arg7[%c0_8, %c0_9] : memref<1x128xf32, #tpu.memory_space<vmem>>, vector<1x128xf32>
    %17 = vector.shape_cast %11 : vector<1x1xi1> to vector<1x1xi1>
    %18 = vector.broadcast %17 : vector<1x1xi1> to vector<1x128xi1>
    %19 = arith.select %18, %16, %9 : vector<1x128xi1>, vector<1x128xf32>
    %c4_i32_10 = arith.constant 4 : i32
    %20 = vector.broadcast %c4_i32_10 : i32 to vector<1x128xi32>
    %21 = arith.cmpi slt, %5, %20 : vector<1x128xi32>
    %22 = arith.select %21, %15, %8 : vector<1x128xi1>, vector<1x128xf32>
    %23 = arith.select %21, %19, %9 : vector<1x128xi1>, vector<1x128xf32>
    %c0_11 = arith.constant 0 : index
    %c0_12 = arith.constant 0 : index
    %24 = vector.load %arg6[%c0_11, %c0_12] : memref<1x128xf32, #tpu.memory_space<vmem>>, vector<1x128xf32>
    tpu.vector_store %arg6[%c0_11, %c0_12], %8 {strides = array<i32>} : memref<1x128xf32, #tpu.memory_space<vmem>>, vector<1x128xf32>,
    %c0_13 = arith.constant 0 : index
    %c0_14 = arith.constant 0 : index
    %25 = vector.load %arg7[%c0_13, %c0_14] : memref<1x128xf32, #tpu.memory_space<vmem>>, vector<1x128xf32>
    tpu.vector_store %arg7[%c0_13, %c0_14], %9 {strides = array<i32>} : memref<1x128xf32, #tpu.memory_space<vmem>>, vector<1x128xf32>,
    %cst = arith.constant -0.949999988 : f32
    %26 = vector.broadcast %cst : f32 to vector<1x128xf32>
    %27 = arith.mulf %26, %22 : vector<1x128xf32>
    %28 = arith.addf %7, %27 : vector<1x128xf32>
    %cst_15 = arith.constant -0.949999988 : f32
    %29 = vector.broadcast %cst_15 : f32 to vector<1x128xf32>
    %30 = arith.mulf %29, %23 : vector<1x128xf32>
    %31 = arith.addf %4, %30 : vector<1x128xf32>
    %32 = arith.mulf %28, %28 : vector<1x128xf32>
    %33 = arith.mulf %31, %31 : vector<1x128xf32>
    %c1_i32 = arith.constant 1 : i32
    %34 = arith.muli %arg0, %c1_i32 : i32
    %35 = vector.broadcast %34 : i32 to vector<1x1xi32>
    %36 = arith.addi %6, %35 : vector<1x1xi32>
    %c0_i32_16 = arith.constant 0 : i32
    %37 = vector.broadcast %c0_i32_16 : i32 to vector<1x1xi32>
    %38 = arith.cmpi slt, %36, %37 : vector<1x1xi32>
    %c0_i32_17 = arith.constant 0 : i32
    %39 = vector.broadcast %c0_i32_17 : i32 to vector<1x1xi32>
    %40 = arith.cmpi eq, %36, %39 : vector<1x1xi32>
    %c64_i32 = arith.constant 64 : i32
    %41 = vector.broadcast %c64_i32 : i32 to vector<1x128xi32>
    %42 = arith.cmpi slt, %5, %41 : vector<1x128xi32>
    %43 = vector.broadcast %40 : vector<1x1xi1> to vector<1x128xi1>
    %44 = arith.andi %43, %42 : vector<1x128xi1>
    %45 = vector.broadcast %38 : vector<1x1xi1> to vector<1x128xi1>
    %46 = arith.ori %45, %44 : vector<1x128xi1>
    %cst_18 = arith.constant 0.000000e+00 : f32
    %47 = vector.broadcast %cst_18 : f32 to vector<1x128xf32>
    %48 = arith.select %46, %32, %47 : vector<1x128xi1>, vector<1x128xf32>
    %cst_19 = arith.constant 0.000000e+00 : f32
    %49 = vector.broadcast %cst_19 : f32 to vector<1x128xf32>
    %50 = arith.select %46, %33, %49 : vector<1x128xi1>, vector<1x128xf32>
    %c0_20 = arith.constant 0 : index
    %c0_21 = arith.constant 0 : index
    %51 = vector.load %arg4[%c0_20, %c0_21] : memref<1x128xf32, #tpu.memory_space<vmem>>, vector<1x128xf32>
    %cst_22 = arith.constant dense<0.000000e+00> : vector<128xf32>
    %52 = vector.multi_reduction <add>, %48, %cst_22 [0] : vector<1x128xf32> to vector<128xf32>
    %53 = vector.shape_cast %52 : vector<128xf32> to vector<1x128xf32>
    %54 = arith.addf %51, %53 : vector<1x128xf32>
    %c0_23 = arith.constant 0 : index
    %c0_24 = arith.constant 0 : index
    %55 = vector.load %arg4[%c0_23, %c0_24] : memref<1x128xf32, #tpu.memory_space<vmem>>, vector<1x128xf32>
    tpu.vector_store %arg4[%c0_23, %c0_24], %54 {strides = array<i32>} : memref<1x128xf32, #tpu.memory_space<vmem>>, vector<1x128xf32>,
    %c0_25 = arith.constant 0 : index
    %c0_26 = arith.constant 0 : index
    %56 = vector.load %arg5[%c0_25, %c0_26] : memref<1x128xf32, #tpu.memory_space<vmem>>, vector<1x128xf32>
    %cst_27 = arith.constant dense<0.000000e+00> : vector<128xf32>
    %57 = vector.multi_reduction <add>, %50, %cst_27 [0] : vector<1x128xf32> to vector<128xf32>
    %58 = vector.shape_cast %57 : vector<128xf32> to vector<1x128xf32>
    %59 = arith.addf %56, %58 : vector<1x128xf32>
    %c0_28 = arith.constant 0 : index
    %c0_29 = arith.constant 0 : index
    %60 = vector.load %arg5[%c0_28, %c0_29] : memref<1x128xf32, #tpu.memory_space<vmem>>, vector<1x128xf32>
    tpu.vector_store %arg5[%c0_28, %c0_29], %59 {strides = array<i32>} : memref<1x128xf32, #tpu.memory_space<vmem>>, vector<1x128xf32>,
    %c0_i32_30 = arith.constant 0 : i32
    %61 = arith.cmpi eq, %arg0, %c0_i32_30 : i32
    %62 = arith.extui %61 : i1 to i32
    %c0_i32_31 = arith.constant 0 : i32
    %63 = arith.cmpi ne, %62, %c0_i32_31 : i32
    scf.if %63 {
      %c0_32 = arith.constant 0 : index
      %c0_33 = arith.constant 0 : index
      %64 = vector.load %arg4[%c0_32, %c0_33] : memref<1x128xf32, #tpu.memory_space<vmem>>, vector<1x128xf32>
      %65 = vector.shape_cast %64 : vector<1x128xf32> to vector<1x1x128xf32>
      %cst_34 = arith.constant dense<0.000000e+00> : vector<1xf32>
      %66 = vector.multi_reduction <add>, %65, %cst_34 [1, 2] : vector<1x1x128xf32> to vector<1xf32>
      %67 = vector.shape_cast %66 : vector<1xf32> to vector<1x1x1xf32>
      %68 = vector.extract %67[0, 0, 0] : f32 from vector<1x1x1xf32>
      %69 = vector.broadcast %68 : f32 to vector<1x1xf32>
      %c0_35 = arith.constant 0 : index
      %c0_36 = arith.constant 0 : index
      %70 = vector.load %arg5[%c0_35, %c0_36] : memref<1x128xf32, #tpu.memory_space<vmem>>, vector<1x128xf32>
      %71 = vector.shape_cast %70 : vector<1x128xf32> to vector<1x1x128xf32>
      %cst_37 = arith.constant dense<0.000000e+00> : vector<1xf32>
      %72 = vector.multi_reduction <add>, %71, %cst_37 [1, 2] : vector<1x1x128xf32> to vector<1xf32>
      %73 = vector.shape_cast %72 : vector<1xf32> to vector<1x1x1xf32>
      %74 = vector.extract %73[0, 0, 0] : f32 from vector<1x1x1xf32>
      %75 = vector.broadcast %74 : f32 to vector<1x1xf32>
      %cst_38 = arith.constant 6.400000e-04 : f32
      %76 = vector.broadcast %cst_38 : f32 to vector<1x1xf32>
      %77 = arith.addf %75, %76 : vector<1x1xf32>
      %78 = arith.divf %69, %77 : vector<1x1xf32>
      %c0_39 = arith.constant 0 : index
      %c0_40 = arith.constant 0 : index
      %79 = vector.load %arg3[%c0_39, %c0_40] : memref<1x1xf32, #tpu.memory_space<vmem>>, vector<1x1xf32>
      tpu.vector_store %arg3[%c0_39, %c0_40], %78 {strides = array<i32>} : memref<1x1xf32, #tpu.memory_space<vmem>>, vector<1x1xf32>,
    } else {
    }
    return
  }
  func.func @transform_0(%arg0: i32) -> (i32, i32) {
    %c0_i32 = arith.constant 0 : i32
    %c0_i32_0 = arith.constant 0 : i32
    return %arg0, %c0_i32 : i32, i32
  }
  func.func @transform_1(%arg0: i32) -> (i32, i32) {
    %c0_i32 = arith.constant 0 : i32
    %c0_i32_0 = arith.constant 0 : i32
    return %arg0, %c0_i32 : i32, i32
  }
  func.func @transform_2(%arg0: i32) -> (i32, i32) {
    %c0_i32 = arith.constant 0 : i32
    %c0_i32_0 = arith.constant 0 : i32
    %c0_i32_1 = arith.constant 0 : i32
    return %c0_i32, %c0_i32_0 : i32, i32
  }
}

</mosaic_0001>

<bundles_post_ra>
// kernel: tpu_custom_call.1
= control target key start
LH: loop header
LB: loop body
LE: loop exit
PB: predicated region body
PF: predicated region fallthrough
CT: control target
= control target key end

     0   :  { %7 = vsyncpa [#allocation7], 0  ;;  %s212_s0 = inlined_call_operand.hbm [shape: f32[1,128], index: 0, kind: input, shape index: {}]   ;;  %s213_s1 = inlined_call_operand.vmem [shape: f32[1,128], index: 1, kind: input, shape index: {}]   ;;  %s214_s2 = inlined_call_operand.hbm [shape: f32[1,1], index: 2, kind: output, shape index: {}]  }
   0x1   :  { %8 = vsyncpa [#allocation8], 0  ;;  %s184_s9 = smov [#allocation6]  }
   0x2   :  { %s15_s10 = sshll.u32 %s184_s9, 4  ;;  %s16_s10 = int_to_ptr.vmem [resolvable:$true] %s15_s10 }
   0x3   :  { %s148_s11 = scalar_lea.vmem %s16_s10, 16  ;;  %s152_s12 = scalar_lea.vmem %s16_s10, 32 }
   0x4   :  { %p149_p0 = scmp.ne.s32.totalorder %s16_s10, %s148_s11  ;;  %p153_p1 = scmp.lt.s32.totalorder %s16_s10, %s16_s10 }
   0x5   :  { %p154_p2 = scmp.lt.s32.totalorder %s152_s12, %s148_s11 }
   0x7   :  { %p155_p3 = por %p154_p2, %p153_p1 }
   0x9   :  { %p156_p4 = pnand %p155_p3, %p149_p0 }
   0xb   :  { %159 = shalt.err (!%p156_p4)
}
   0xc   :  { %18 = dma.hbm_to_vmem [thread:$0]  %s212_s0, 16, %s16_s10, [#allocation7]  }
   0xd   :  { %180 = dma.done.wait [#allocation7], 16  }
   0xe   :  { %181 = vsyncadd [#allocation7], 4294967280  ;;  %v185_v0 = vmov 0.0   ;;  %v32_v1 = vld [vmem:[#allocation6] sm:$0x1]  ;;  %s186_s17 = smov 4   ;;  %v34_v4 = vlaneseq }
   0xf   :  { %28 = vst [vmem:[#allocation2] sm:$0x1] %v185_v0  ;;  %29 = vst [vmem:[#allocation3] sm:$0x1] %v185_v0  ;;  %v33_v2 = vld [vmem:[%s213_s1] sm:$0x1] }
  0x10   :  { %30 = vst [vmem:[#allocation4] sm:$0x1] %v185_v0  ;;  %31 = vst [vmem:[#allocation5] sm:$0x1] %v185_v0  ;;  %v38_v3 = vsub.f32 %v33_v2, %v32_v1  ;;  %v37_v5 = vshrl.u32 %v34_v4, 7  ;;  %v35_v6 = vand.u32 127, %v34_v4 }
  0x11   :  { %vm86_vm4 = vcmask 1040384   ;;  %s187_s18 = smov [#allocation9]   ;;  %vm113_vm5 = vcmask 0  }
  0x12   :  { %39 = vrot.lane.b32.xlu0 %v38_v3, %s186_s17  ;;  %vm43_vm0 = vcmp.eq.s32.totalorder %v37_v5, 0  ;;  %vm50_vm1 = vcmp.lt.s32.totalorder %v35_v6, 4  ;;  %vm65_vm2 = vcmp.lt.s32.totalorder %v35_v6, 64  ;;  %s121_s19 = sshll.u32 %s187_s18, 4  ;;  %s122_s19 = int_to_ptr.vmem [resolvable:$true] %s121_s19 }
  0x13   :  { %vm68_vm3 = vmand %vm43_vm0, %vm65_vm2  ;;  %s160_s20 = scalar_lea.vmem %s122_s19, 16  ;;  %s164_s21 = scalar_lea.vmem %s122_s19, 32 }
  0x14   :  { %p161_p5 = scmp.ne.s32.totalorder %s122_s19, %s160_s20  ;;  %p165_p6 = scmp.lt.s32.totalorder %s122_s19, %s122_s19 }
  0x15   :  { %p166_p7 = scmp.lt.s32.totalorder %s164_s21, %s160_s20 }
  0x16   :  { %41 = vrot.lane.b32.xlu0 %v33_v2, %s186_s17  ;;  %v74_v19 = vld [vmem:[#allocation2] sm:$0x1]  ;;  %v78_v24 = vld [vmem:[#allocation3] sm:$0x1] }
  0x17   :  { %v44_v7 = vld [vmem:[#allocation4] sm:$0x1]  ;;  %v48_v11 = vld [vmem:[#allocation5] sm:$0x1]  ;;  %p167_p8 = por %p166_p7, %p165_p6 }
  0x19   :  { %p168_p9 = pnand %p167_p8, %p161_p5 }
  0x84   :  { %v40_v8 = vpop.permute.xlu0 %39 }
  0x85   :  { %v47_v9 = vsel %vm43_vm0, %v44_v7, %v40_v8  ;;  %53 = vst [vmem:[#allocation4] sm:$0x1] %v40_v8 }
  0x86   :  { %v51_v10 = vsel %vm50_vm1, %v47_v9, %v40_v8 }
  0x87   :  { %v55_v12 = vmul.f32 -0.95, %v51_v10 }
  0x88   :  { %v42_v13 = vpop.permute.xlu0 %41 }
  0x89   :  { %v56_v14 = vadd.f32 %v55_v12, %v38_v3  ;;  %v49_v15 = vsel %vm43_vm0, %v48_v11, %v42_v13  ;;  %54 = vst [vmem:[#allocation5] sm:$0x1] %v42_v13 }
  0x8a   :  { %v52_v16 = vsel %vm50_vm1, %v49_v15, %v42_v13 }
  0x8b   :  { %v59_v17 = vmul.f32 %v56_v14, %v56_v14  ;;  %v57_v18 = vmul.f32 -0.95, %v52_v16 }
  0x8d   :  { %v58_v20 = vadd.f32 %v57_v18, %v33_v2  ;;  %v72_v21 = vsel %vm68_vm3, %v59_v17, 0.0 }
  0x8e   :  { %v76_v22 = vadd.f32 %v74_v19, %v72_v21 }
  0x8f   :  { %v60_v23 = vmul.f32 %v58_v20, %v58_v20 }
  0x90   :  { %77 = vst [vmem:[#allocation2] sm:$0x1] %v76_v22 }
  0x91   :  { %v73_v25 = vsel %vm68_vm3, %v60_v23, 0.0 }
  0x92   :  { %v80_v26 = vadd.f32 %v78_v24, %v73_v25 }
  0x94   :  { %81 = vst [vmem:[#allocation3] sm:$0x1] %v80_v26 }
  0x97   :  { %v85_v27 = vld [vmem:[#allocation2] sm:$0x1] }
  0x98   :  { %v87_v28 = vsel %vm86_vm4, %v85_v27, 0.0 }
  0x99   :  { %88 = vadd.xlane.f32.xlu1 %v87_v28 }
  0x9b   :  { %v98_v29 = vld [vmem:[#allocation3] sm:$0x1] }
  0x9c   :  { %v99_v30 = vsel %vm86_vm4, %v98_v29, 0.0 }
  0x9d   :  { %100 = vadd.xlane.f32.xlu1 %v99_v30 }
 0x122   :  { %v89_v31 = vpop.xlane.xlu1 %88 }
 0x123   :  { %v90_v32 = vrot.slane %v89_v31, 4 }
 0x125   :  { %v91_v33 = vadd.f32 %v90_v32, %v89_v31 }
 0x126   :  { %v101_v34 = vpop.xlane.xlu1 %100 }
 0x127   :  { %v92_v35 = vrot.slane %v91_v33, 2  ;;  %v102_v36 = vrot.slane %v101_v34, 4 }
 0x129   :  { %v103_v37 = vadd.f32 %v102_v36, %v101_v34  ;;  %v93_v38 = vadd.f32 %v92_v35, %v91_v33 }
 0x12b   :  { %v104_v39 = vrot.slane %v103_v37, 2  ;;  %v94_v40 = vrot.slane %v93_v38, 1 }
 0x12d   :  { %v105_v41 = vadd.f32 %v104_v39, %v103_v37  ;;  %v95_v42 = vadd.f32 %v94_v40, %v93_v38 }
 0x12f   :  { %130 = vpush %v95_v42  ;;  %v106_v43 = vrot.slane %v105_v41, 1 }
 0x131   :  { %v107_v44 = vadd.f32 %v106_v43, %v105_v41 }
 0x133   :  { %132 = vpush %v107_v44 }
 0x160   :  { %s131_s0 = spop %130 }
 0x161   :  { %v97_v48 = vstv %s131_s0 }
 0x164   :  { %s133_s1 = spop %132 }
 0x165   :  { %v109_v45 = vstv %s133_s1 }
 0x166   :  { %v110_v46 = vadd.f32 0.00064, %v109_v45 }
 0x168   :  { %138 = vrcp.f32 %v110_v46 }
 0x175   :  { %v139_v47 = vpop.eup %138 }
 0x176   :  { %v112_v49 = vmul.f32 %v139_v47, %v97_v48 }
 0x178   :  { %114 = vst.msk [vmem:[#allocation9] sm:$0x1] %vm113_vm5, %v112_v49 }
 0x179   :  { %171 = shalt.err (!%p168_p9)
}
 0x17a   :  { %124 = dma.vmem_to_hbm [thread:$0]  %s122_s19, 16, %s214_s2, [#allocation8]  }
 0x17b   :  { %182 = dma.done.wait [#allocation8], 16  }
 0x17c   :  { %183 = vsyncadd [#allocation8], 4294967280 }
 0x17d   :  { %128 = vsyncpa [#allocation7], 1 }
 0x17e   :  { %129 = vsyncpa [#allocation8], 1 }

</bundles_post_ra>
